<compile_context>
chip_gen: v7x
topology: tpu7x:2x2x1
jax: 0.10.0
libtpu: 0.0.40
codegen_flags: <defaults>
</compile_context>

<pallas_src>
import functools

import jax
import jax.numpy as jnp
import numpy as np
from jax import lax
from jax.experimental import pallas as pl
from jax.experimental.pallas import tpu as pltpu


def dam_kernel(rgb_ref, dep_ref, w1t_ref, w2_ref, cmat_ref, out_ref, *,
               n_batch, channels):
    """Single grid step.  rgb/dep/out refs are lane-dense (N*C, HW) slabs."""
    N, C = n_batch, channels

    rgb2d = rgb_ref[...].astype(jnp.float32)            # (N*C, HW)
    dep2d = dep_ref[...].astype(jnp.float32)            # (N*C, HW)
    w1t = w1t_ref[...]                                   # (2C, 2C), layout [in, out]
    w2 = w2_ref[...]                                     # (C, 2C),  layout [out, in]

    # ---------------- CA_Enhance ----------------
    # AdaptiveMaxPool2d(1) over spatial of cat([rgb, depth], channel):
    # two lane reductions over the full (N*C, HW) slabs.
    m_rgb = jnp.max(rgb2d, axis=-1, keepdims=True)       # (N*C, 1) == pooled[:, 0:C]
    m_dep = jnp.max(dep2d, axis=-1, keepdims=True)       # (N*C, 1) == pooled[:, C:2C]

    # fc1 (1x1 conv, no bias) + ReLU, fc2 + sigmoid.  The batch is tiny, so this
    # is statically unrolled; each body is a couple of VPU broadcast-mul + sums.
    ca_rows = []
    for n in range(N):
        mr = m_rgb[n * C:(n + 1) * C]                     # (C, 1)
        md = m_dep[n * C:(n + 1) * C]                     # (C, 1)
        y = (jnp.sum(w1t[:C] * mr, axis=0, keepdims=True) +
             jnp.sum(w1t[C:] * md, axis=0, keepdims=True))  # (1, 2C)
        y = jnp.maximum(y, 0.0)
        z = jnp.sum(w2 * y, axis=-1, keepdims=True)       # (C, 1)
        ca_rows.append(jax.nn.sigmoid(z))
    ca = jnp.concatenate(ca_rows, axis=0)                 # (N*C, 1)

    x_d = dep2d * ca                                      # depth.mul(sigmoid(out))

    # ---------------- SA_Enhance ----------------
    # Per-batch channel max -> (N, HW), stays lane-dense.
    sa_rows = [jnp.max(x_d[n * C:(n + 1) * C], axis=0, keepdims=True)
               for n in range(N)]
    sa_in = jnp.concatenate(sa_rows, axis=0)              # (N, HW)

    # 7x7 "same" zero-padded conv as ONE MXU matmul against the precomputed
    # boundary-masked convolution matrix (HW, HW).
    conv = jnp.dot(sa_in, cmat_ref[...],
                   preferred_element_type=jnp.float32)    # (N, HW)
    sa = jax.nn.sigmoid(conv)                             # (N, HW)

    # depth_enhance = depth * sa (original depth, per DAM_module.forward).
    # Assemble the full (N*C, HW) slab and issue one dense store.
    out_rows = [dep2d[n * C:(n + 1) * C] * sa[n:n + 1] for n in range(N)]
    out_ref[...] = jnp.concatenate(out_rows, axis=0).astype(out_ref.dtype)


def _conv_matrix(wc, H, W):
    """(HW, HW) f32 matrix M with M[q, p] = k[a, b] when input pixel q feeds
    output pixel p through tap (a, b) of the 7x7 zero-padded 'same' conv
    (out-of-bounds taps simply have no entry).  conv = sa_in @ M."""
    HW = H * W
    k = np.asarray(wc, dtype=np.float32).reshape(7, 7)
    pi = np.arange(H)[:, None]
    pj = np.arange(W)[None, :]
    p = (pi * W + pj).reshape(-1)
    M = np.zeros((HW, HW), np.float32)
    for a in range(7):
        for b in range(7):
            qi = pi + a - 3
            qj = pj + b - 3
            valid = ((qi >= 0) & (qi < H) & (qj >= 0) & (qj < W)).reshape(-1)
            q = (np.clip(qi, 0, H - 1) * W + np.clip(qj, 0, W - 1)).reshape(-1)
            M[q[valid], p[valid]] = k[a, b]
    return jnp.asarray(M)


def dam_forward(rgb, depth, w1, w2, wc):
    """rgb/depth: (N, C, H, W); w1: (2C, 2C, 1, 1); w2: (C, 2C, 1, 1);
    wc: (1, 1, 7, 7).  Returns depth_enhance (N, C, H, W)."""
    # TODO(synk): _conv_matrix builds the conv matrix on the host from concrete
    # wc; hoist/precompute it if dam_forward is ever jitted with traced weights.
    N, C, H, W = depth.shape
    C2 = 2 * C
    HW = H * W

    rgb_f = rgb.reshape(N * C, HW)                                   # lane-dense layout
    dep_f = depth.reshape(N * C, HW)
    w1t = jnp.transpose(w1.reshape(C2, C2)).astype(jnp.float32)      # [in, out]
    w2f = w2.reshape(C, C2).astype(jnp.float32)                      # [out, in]
    cmat = _conv_matrix(wc, H, W)                                    # (HW, HW)

    out_flat = pl.pallas_call(
        functools.partial(dam_kernel, n_batch=N, channels=C),
        out_shape=jax.ShapeDtypeStruct((N * C, HW), depth.dtype),
        grid=(1,),                                                   # one fused step
        in_specs=[
            pl.BlockSpec((N * C, HW), lambda i: (0, 0)),             # rgb slab
            pl.BlockSpec((N * C, HW), lambda i: (0, 0)),             # depth slab
            pl.BlockSpec((C2, C2), lambda i: (0, 0)),                # fc1 weight^T
            pl.BlockSpec((C, C2), lambda i: (0, 0)),                 # fc2 weight
            pl.BlockSpec((HW, HW), lambda i: (0, 0)),                # conv matrix
        ],
        out_specs=pl.BlockSpec((N * C, HW), lambda i: (0, 0)),
        compiler_params=pltpu.CompilerParams(
            dimension_semantics=("arbitrary",)),
    )(rgb_f, dep_f, w1t, w2f, cmat)
    return out_flat.reshape(N, C, H, W)


def dam_reference(rgb, depth, w1, w2, wc):
    """Pure-JAX reference mirroring the PyTorch module."""
    x = jnp.concatenate([rgb, depth], axis=1)                  # (N, 2C, H, W)
    m = jnp.max(x, axis=(2, 3))                                # AdaptiveMaxPool2d(1)
    y = jnp.maximum(jnp.einsum('oi,ni->no', w1[:, :, 0, 0], m), 0.0)
    z = jnp.einsum('oi,ni->no', w2[:, :, 0, 0], y)
    ca = jax.nn.sigmoid(z)[:, :, None, None]
    x_d = depth * ca
    sa_in = jnp.max(x_d, axis=1, keepdims=True)                # (N, 1, H, W)
    conv = lax.conv_general_dilated(sa_in, wc, (1, 1), [(3, 3), (3, 3)],
                                    dimension_numbers=('NCHW', 'OIHW', 'NCHW'))
    sa = jax.nn.sigmoid(conv)
    return depth * sa


if __name__ == "__main__":
    # depth/rgb each have C channels; in_planes for DAM_module is 2*C.
    N, C, H, W = 2, 4, 16, 16
    key = jax.random.PRNGKey(0)
    k1, k2, k3, k4, k5 = jax.random.split(key, 5)
    rgb = jax.random.normal(k1, (N, C, H, W), dtype=jnp.float32)
    depth = jax.random.normal(k2, (N, C, H, W), dtype=jnp.float32)
    w1 = 0.5 * jax.random.normal(k3, (2 * C, 2 * C, 1, 1), dtype=jnp.float32)
    w2 = 0.5 * jax.random.normal(k4, (C, 2 * C, 1, 1), dtype=jnp.float32)
    wc = 0.2 * jax.random.normal(k5, (1, 1, 7, 7), dtype=jnp.float32)

    out = jax.block_until_ready(dam_forward(rgb, depth, w1, w2, wc))
    ref = jax.block_until_ready(dam_reference(rgb, depth, w1, w2, wc))
    assert out.shape == (N, C, H, W)
    max_err = float(jnp.max(jnp.abs(out - ref)))
    assert max_err < 1e-3, f"mismatch vs reference: {max_err}"
    print("KERNEL_OK")
</pallas_src>

<mosaic_0001>
module attributes {stable_mosaic.version = 11 : i64} {
  func.func @dam_kernel(%arg0: i32, %arg1: memref<8x256xf32, #tpu.memory_space<vmem>>, %arg2: memref<8x256xf32, #tpu.memory_space<vmem>>, %arg3: memref<8x8xf32, #tpu.memory_space<vmem>>, %arg4: memref<4x8xf32, #tpu.memory_space<vmem>>, %arg5: memref<256x256xf32, #tpu.memory_space<vmem>>, %arg6: memref<8x256xf32, #tpu.memory_space<vmem>>) attributes {dimension_semantics = [#tpu.dimension_semantics<arbitrary>], iteration_bounds = array<i64: 1>, scalar_prefetch = 0 : i64, scratch_operands = 0 : i64, tpu.core_type = #tpu.core_type<tc>, window_params = [{pipeline_mode = #tpu.pipeline_mode<synchronous>, transform_indices = @transform_0, window_bounds = array<i64: 8, 256>}, {pipeline_mode = #tpu.pipeline_mode<synchronous>, transform_indices = @transform_1, window_bounds = array<i64: 8, 256>}, {pipeline_mode = #tpu.pipeline_mode<synchronous>, transform_indices = @transform_2, window_bounds = array<i64: 8, 8>}, {pipeline_mode = #tpu.pipeline_mode<synchronous>, transform_indices = @transform_3, window_bounds = array<i64: 4, 8>}, {pipeline_mode = #tpu.pipeline_mode<synchronous>, transform_indices = @transform_4, window_bounds = array<i64: 256, 256>}, {pipeline_mode = #tpu.pipeline_mode<synchronous>, transform_indices = @transform_5, window_bounds = array<i64: 8, 256>}]} {
    %c0 = arith.constant 0 : index
    %c0_0 = arith.constant 0 : index
    %0 = vector.load %arg1[%c0, %c0_0] : memref<8x256xf32, #tpu.memory_space<vmem>>, vector<8x256xf32>
    %c0_1 = arith.constant 0 : index
    %c0_2 = arith.constant 0 : index
    %1 = vector.load %arg2[%c0_1, %c0_2] : memref<8x256xf32, #tpu.memory_space<vmem>>, vector<8x256xf32>
    %c0_3 = arith.constant 0 : index
    %c0_4 = arith.constant 0 : index
    %2 = vector.load %arg3[%c0_3, %c0_4] : memref<8x8xf32, #tpu.memory_space<vmem>>, vector<8x8xf32>
    %c0_5 = arith.constant 0 : index
    %c0_6 = arith.constant 0 : index
    %3 = vector.load %arg4[%c0_5, %c0_6] : memref<4x8xf32, #tpu.memory_space<vmem>>, vector<4x8xf32>
    %cst = arith.constant dense<0xFF800000> : vector<8xf32>
    %4 = vector.multi_reduction <maximumf>, %0, %cst [1] : vector<8x256xf32> to vector<8xf32>
    %5 = vector.shape_cast %4 : vector<8xf32> to vector<8x1xf32>
    %cst_7 = arith.constant dense<0xFF800000> : vector<8xf32>
    %6 = vector.multi_reduction <maximumf>, %1, %cst_7 [1] : vector<8x256xf32> to vector<8xf32>
    %7 = vector.shape_cast %6 : vector<8xf32> to vector<8x1xf32>
    %8 = vector.extract_strided_slice %5 {offsets = [0, 0], sizes = [4, 1], strides = [1, 1]} : vector<8x1xf32> to vector<4x1xf32>
    %9 = vector.extract_strided_slice %7 {offsets = [0, 0], sizes = [4, 1], strides = [1, 1]} : vector<8x1xf32> to vector<4x1xf32>
    %10 = vector.extract_strided_slice %2 {offsets = [0, 0], sizes = [4, 8], strides = [1, 1]} : vector<8x8xf32> to vector<4x8xf32>
    %11 = vector.broadcast %8 : vector<4x1xf32> to vector<4x8xf32>
    %12 = arith.mulf %10, %11 : vector<4x8xf32>
    %cst_8 = arith.constant dense<0.000000e+00> : vector<8xf32>
    %13 = vector.multi_reduction <add>, %12, %cst_8 [0] : vector<4x8xf32> to vector<8xf32>
    %14 = vector.shape_cast %13 : vector<8xf32> to vector<1x8xf32>
    %15 = vector.extract_strided_slice %2 {offsets = [4, 0], sizes = [4, 8], strides = [1, 1]} : vector<8x8xf32> to vector<4x8xf32>
    %16 = vector.broadcast %9 : vector<4x1xf32> to vector<4x8xf32>
    %17 = arith.mulf %15, %16 : vector<4x8xf32>
    %cst_9 = arith.constant dense<0.000000e+00> : vector<8xf32>
    %18 = vector.multi_reduction <add>, %17, %cst_9 [0] : vector<4x8xf32> to vector<8xf32>
    %19 = vector.shape_cast %18 : vector<8xf32> to vector<1x8xf32>
    %20 = arith.addf %14, %19 : vector<1x8xf32>
    %cst_10 = arith.constant 0.000000e+00 : f32
    %21 = vector.broadcast %cst_10 : f32 to vector<1x8xf32>
    %22 = arith.maximumf %20, %21 : vector<1x8xf32>
    %23 = vector.broadcast %22 : vector<1x8xf32> to vector<4x8xf32>
    %24 = arith.mulf %3, %23 : vector<4x8xf32>
    %cst_11 = arith.constant dense<0.000000e+00> : vector<4xf32>
    %25 = vector.multi_reduction <add>, %24, %cst_11 [1] : vector<4x8xf32> to vector<4xf32>
    %26 = vector.shape_cast %25 : vector<4xf32> to vector<4x1xf32>
    %27 = arith.negf %26 : vector<4x1xf32>
    %28 = math.exp %27 : vector<4x1xf32>
    %cst_12 = arith.constant 1.000000e+00 : f32
    %29 = vector.broadcast %cst_12 : f32 to vector<4x1xf32>
    %30 = arith.addf %29, %28 : vector<4x1xf32>
    %31 = arith.divf %29, %30 : vector<4x1xf32>
    %32 = vector.extract_strided_slice %5 {offsets = [4, 0], sizes = [4, 1], strides = [1, 1]} : vector<8x1xf32> to vector<4x1xf32>
    %33 = vector.extract_strided_slice %7 {offsets = [4, 0], sizes = [4, 1], strides = [1, 1]} : vector<8x1xf32> to vector<4x1xf32>
    %34 = vector.extract_strided_slice %2 {offsets = [0, 0], sizes = [4, 8], strides = [1, 1]} : vector<8x8xf32> to vector<4x8xf32>
    %35 = vector.broadcast %32 : vector<4x1xf32> to vector<4x8xf32>
    %36 = arith.mulf %34, %35 : vector<4x8xf32>
    %cst_13 = arith.constant dense<0.000000e+00> : vector<8xf32>
    %37 = vector.multi_reduction <add>, %36, %cst_13 [0] : vector<4x8xf32> to vector<8xf32>
    %38 = vector.shape_cast %37 : vector<8xf32> to vector<1x8xf32>
    %39 = vector.extract_strided_slice %2 {offsets = [4, 0], sizes = [4, 8], strides = [1, 1]} : vector<8x8xf32> to vector<4x8xf32>
    %40 = vector.broadcast %33 : vector<4x1xf32> to vector<4x8xf32>
    %41 = arith.mulf %39, %40 : vector<4x8xf32>
    %cst_14 = arith.constant dense<0.000000e+00> : vector<8xf32>
    %42 = vector.multi_reduction <add>, %41, %cst_14 [0] : vector<4x8xf32> to vector<8xf32>
    %43 = vector.shape_cast %42 : vector<8xf32> to vector<1x8xf32>
    %44 = arith.addf %38, %43 : vector<1x8xf32>
    %cst_15 = arith.constant 0.000000e+00 : f32
    %45 = vector.broadcast %cst_15 : f32 to vector<1x8xf32>
    %46 = arith.maximumf %44, %45 : vector<1x8xf32>
    %47 = vector.broadcast %46 : vector<1x8xf32> to vector<4x8xf32>
    %48 = arith.mulf %3, %47 : vector<4x8xf32>
    %cst_16 = arith.constant dense<0.000000e+00> : vector<4xf32>
    %49 = vector.multi_reduction <add>, %48, %cst_16 [1] : vector<4x8xf32> to vector<4xf32>
    %50 = vector.shape_cast %49 : vector<4xf32> to vector<4x1xf32>
    %51 = arith.negf %50 : vector<4x1xf32>
    %52 = math.exp %51 : vector<4x1xf32>
    %cst_17 = arith.constant 1.000000e+00 : f32
    %53 = vector.broadcast %cst_17 : f32 to vector<4x1xf32>
    %54 = arith.addf %53, %52 : vector<4x1xf32>
    %55 = arith.divf %53, %54 : vector<4x1xf32>
    %56 = tpu.concatenate %31, %55 in 0 : vector<4x1xf32>, vector<4x1xf32> -> vector<8x1xf32>
    %57 = vector.broadcast %56 : vector<8x1xf32> to vector<8x256xf32>
    %58 = arith.mulf %1, %57 : vector<8x256xf32>
    %59 = vector.extract_strided_slice %58 {offsets = [0, 0], sizes = [4, 256], strides = [1, 1]} : vector<8x256xf32> to vector<4x256xf32>
    %cst_18 = arith.constant dense<0xFF800000> : vector<256xf32>
    %60 = vector.multi_reduction <maximumf>, %59, %cst_18 [0] : vector<4x256xf32> to vector<256xf32>
    %61 = vector.shape_cast %60 : vector<256xf32> to vector<1x256xf32>
    %62 = vector.extract_strided_slice %58 {offsets = [4, 0], sizes = [4, 256], strides = [1, 1]} : vector<8x256xf32> to vector<4x256xf32>
    %cst_19 = arith.constant dense<0xFF800000> : vector<256xf32>
    %63 = vector.multi_reduction <maximumf>, %62, %cst_19 [0] : vector<4x256xf32> to vector<256xf32>
    %64 = vector.shape_cast %63 : vector<256xf32> to vector<1x256xf32>
    %65 = tpu.concatenate %61, %64 in 0 : vector<1x256xf32>, vector<1x256xf32> -> vector<2x256xf32>
    %c0_20 = arith.constant 0 : index
    %c0_21 = arith.constant 0 : index
    %66 = vector.load %arg5[%c0_20, %c0_21] : memref<256x256xf32, #tpu.memory_space<vmem>>, vector<256x256xf32>
    %cst_22 = arith.constant dense<0.000000e+00> : vector<2x256xf32>
    %67 = tpu.matmul %65, %66, %cst_22 {dimension_numbers = #tpu.dot_dimension_numbers<[1], [0], [0], [1], [0, 0, 1, 1], [], []>} : vector<2x256xf32>, vector<256x256xf32>, vector<2x256xf32> -> vector<2x256xf32>
    %68 = arith.negf %67 : vector<2x256xf32>
    %69 = math.exp %68 : vector<2x256xf32>
    %cst_23 = arith.constant 1.000000e+00 : f32
    %70 = vector.broadcast %cst_23 : f32 to vector<2x256xf32>
    %71 = arith.addf %70, %69 : vector<2x256xf32>
    %72 = arith.divf %70, %71 : vector<2x256xf32>
    %73 = vector.extract_strided_slice %1 {offsets = [0, 0], sizes = [4, 256], strides = [1, 1]} : vector<8x256xf32> to vector<4x256xf32>
    %74 = vector.extract_strided_slice %72 {offsets = [0, 0], sizes = [1, 256], strides = [1, 1]} : vector<2x256xf32> to vector<1x256xf32>
    %75 = vector.broadcast %74 : vector<1x256xf32> to vector<4x256xf32>
    %76 = arith.mulf %73, %75 : vector<4x256xf32>
    %77 = vector.extract_strided_slice %1 {offsets = [4, 0], sizes = [4, 256], strides = [1, 1]} : vector<8x256xf32> to vector<4x256xf32>
    %78 = vector.extract_strided_slice %72 {offsets = [1, 0], sizes = [1, 256], strides = [1, 1]} : vector<2x256xf32> to vector<1x256xf32>
    %79 = vector.broadcast %78 : vector<1x256xf32> to vector<4x256xf32>
    %80 = arith.mulf %77, %79 : vector<4x256xf32>
    %81 = tpu.concatenate %76, %80 in 0 : vector<4x256xf32>, vector<4x256xf32> -> vector<8x256xf32>
    %c0_24 = arith.constant 0 : index
    %c0_25 = arith.constant 0 : index
    %82 = vector.load %arg6[%c0_24, %c0_25] : memref<8x256xf32, #tpu.memory_space<vmem>>, vector<8x256xf32>
    tpu.vector_store %arg6[%c0_24, %c0_25], %81 {strides = array<i32>} : memref<8x256xf32, #tpu.memory_space<vmem>>, vector<8x256xf32>,
    return
  }
  func.func @transform_0(%arg0: i32) -> (i32, i32) {
    %c0_i32 = arith.constant 0 : i32
    %c0_i32_0 = arith.constant 0 : i32
    %c0_i32_1 = arith.constant 0 : i32
    return %c0_i32, %c0_i32_0 : i32, i32
  }
  func.func @transform_1(%arg0: i32) -> (i32, i32) {
    %c0_i32 = arith.constant 0 : i32
    %c0_i32_0 = arith.constant 0 : i32
    %c0_i32_1 = arith.constant 0 : i32
    return %c0_i32, %c0_i32_0 : i32, i32
  }
  func.func @transform_2(%arg0: i32) -> (i32, i32) {
    %c0_i32 = arith.constant 0 : i32
    %c0_i32_0 = arith.constant 0 : i32
    %c0_i32_1 = arith.constant 0 : i32
    return %c0_i32, %c0_i32_0 : i32, i32
  }
  func.func @transform_3(%arg0: i32) -> (i32, i32) {
    %c0_i32 = arith.constant 0 : i32
    %c0_i32_0 = arith.constant 0 : i32
    %c0_i32_1 = arith.constant 0 : i32
    return %c0_i32, %c0_i32_0 : i32, i32
  }
  func.func @transform_4(%arg0: i32) -> (i32, i32) {
    %c0_i32 = arith.constant 0 : i32
    %c0_i32_0 = arith.constant 0 : i32
    %c0_i32_1 = arith.constant 0 : i32
    return %c0_i32, %c0_i32_0 : i32, i32
  }
  func.func @transform_5(%arg0: i32) -> (i32, i32) {
    %c0_i32 = arith.constant 0 : i32
    %c0_i32_0 = arith.constant 0 : i32
    %c0_i32_1 = arith.constant 0 : i32
    return %c0_i32, %c0_i32_0 : i32, i32
  }
}

</mosaic_0001>

<bundles_post_ra>
// kernel: tpu_custom_call.1
= control target key start
LH: loop header
LB: loop body
LE: loop exit
PB: predicated region body
PF: predicated region fallthrough
CT: control target
= control target key end

     0   :  { %10 = vsyncpa [#allocation3], 0  ;;  %s725_s0 = inlined_call_operand.hbm [shape: f32[8,256], index: 0, kind: input, shape index: {}]   ;;  %s726_s1 = inlined_call_operand.hbm [shape: f32[8,256], index: 1, kind: input, shape index: {}]   ;;  %s727_s2 = inlined_call_operand.hbm [shape: f32[8,8], index: 2, kind: input, shape index: {}]   ;;  %s728_s3 = inlined_call_operand.vmem [shape: f32[4,8], index: 3, kind: input, shape index: {}]   ;;  %s729_s4 = inlined_call_operand.hbm [shape: f32[256,256], index: 4, kind: input, shape index: {}]   ;;  %s730_s5 = inlined_call_operand.hbm [shape: f32[8,256], index: 5, kind: output, shape index: {}]  }
   0x1   :  { %11 = vsyncpa [#allocation6], 0 }
   0x2   :  { %12 = vsyncpa [#allocation9], 0 }
   0x3   :  { %13 = vsyncpa [#allocation4], 0  ;;  %s594_s18 = smov [#allocation5]   ;;  %s595_s20 = smov [#allocation2]  }
   0x4   :  { %s30_s19 = sshll.u32 %s594_s18, 4  ;;  %s20_s21 = sshll.u32 %s595_s20, 4  ;;  %s31_s19 = int_to_ptr.vmem [resolvable:$true] %s30_s19  ;;  %s21_s21 = int_to_ptr.vmem [resolvable:$true] %s20_s21 }
   0x5   :  { %s476_s24 = scalar_lea.hbm %s726_s1, 256 }
   0x6   :  { %p477_p0 = scmp.ne.s32.totalorder %s726_s1, %s476_s24  ;;  %p480_p1 = scmp.lt.u32.totalorder %s476_s24, %s726_s1 }
   0x8   :  { %p482_p2 = pnand %p480_p1, %p477_p0 }
   0xa   :  { %485 = shalt.err (!%p482_p2)
}
   0xb   :  { %s486_s29 = scalar_lea.vmem %s31_s19, 256  ;;  %p491_p4 = scmp.lt.s32.totalorder %s31_s19, %s31_s19 }
   0xc   :  { %p487_p3 = scmp.ne.s32.totalorder %s31_s19, %s486_s29  ;;  %p492_p5 = scmp.lt.s32.totalorder %s486_s29, %s486_s29 }
   0xe   :  { %p493_p6 = por %p492_p5, %p491_p4 }
  0x10   :  { %p494_p7 = pnand %p493_p6, %p487_p3 }
  0x12   :  { %497 = shalt.err (!%p494_p7)
}
  0x13   :  { %33 = dma.hbm_to_vmem [thread:$0]  %s726_s1, 256, %s31_s19, [#allocation6]  }
  0x14   :  { %s498_s9 = scalar_lea.hbm %s725_s0, 256 }
  0x15   :  { %p499_p8 = scmp.ne.s32.totalorder %s725_s0, %s498_s9  ;;  %p502_p9 = scmp.lt.u32.totalorder %s498_s9, %s725_s0 }
  0x17   :  { %p504_p10 = pnand %p502_p9, %p499_p8 }
  0x19   :  { %507 = shalt.err (!%p504_p10)
}
  0x1a   :  { %s508_s14 = scalar_lea.vmem %s21_s21, 256  ;;  %p513_p12 = scmp.lt.s32.totalorder %s21_s21, %s21_s21 }
  0x1b   :  { %p509_p11 = scmp.ne.s32.totalorder %s21_s21, %s508_s14  ;;  %p514_p13 = scmp.lt.s32.totalorder %s508_s14, %s508_s14 }
  0x1d   :  { %p515_p0 = por %p514_p13, %p513_p12 }
  0x1f   :  { %p516_p1 = pnand %p515_p0, %p509_p11 }
  0x21   :  { %519 = shalt.err (!%p516_p1)
}
  0x22   :  { %23 = dma.hbm_to_vmem [thread:$0]  %s725_s0, 256, %s21_s21, [#allocation3]  }
  0x23   :  { %s596_s16 = smov [#allocation7]   ;;  %s597_s18 = smov [#allocation8]  }
  0x24   :  { %s40_s17 = sshll.u32 %s596_s16, 4  ;;  %s51_s19 = sshll.u32 %s597_s18, 4  ;;  %s41_s17 = int_to_ptr.vmem [resolvable:$true] %s40_s17  ;;  %s656_s19 = int_to_ptr.vmem [resolvable:$true] %s51_s19 }
  0x25   :  { %s520_s23 = scalar_lea.hbm %s727_s2, 128 }
  0x26   :  { %p521_p2 = scmp.ne.s32.totalorder %s727_s2, %s520_s23  ;;  %p524_p3 = scmp.lt.u32.totalorder %s520_s23, %s727_s2 }
  0x28   :  { %p526_p4 = pnand %p524_p3, %p521_p2 }
  0x2a   :  { %529 = shalt.err (!%p526_p4)
}
  0x2b   :  { %s530_s0 = scalar_lea.vmem %s41_s17, 128  ;;  %p535_p6 = scmp.lt.s32.totalorder %s41_s17, %s41_s17 }
  0x2c   :  { %p531_p5 = scmp.ne.s32.totalorder %s41_s17, %s530_s0  ;;  %p536_p7 = scmp.lt.s32.totalorder %s530_s0, %s530_s0 }
  0x2e   :  { %p537_p8 = por %p536_p7, %p535_p6 }
  0x30   :  { %p538_p9 = pnand %p537_p8, %p531_p5 }
  0x32   :  { %541 = shalt.err (!%p538_p9)
}
  0x33   :  { %43 = dma.hbm_to_vmem [thread:$0]  %s727_s2, 128, %s41_s17, [#allocation6]  }
  0x34   :  { %s542_s6 = scalar_lea.hbm %s729_s4, 8192 }
  0x35   :  { %p543_p10 = scmp.ne.s32.totalorder %s729_s4, %s542_s6  ;;  %p546_p11 = scmp.lt.u32.totalorder %s542_s6, %s729_s4 }
  0x37   :  { %p548_p12 = pnand %p546_p11, %p543_p10 }
  0x39   :  { %551 = shalt.err (!%p548_p12)
}
  0x3a   :  { %s552_s11 = scalar_lea.vmem %s656_s19, 8192  ;;  %p557_p0 = scmp.lt.s32.totalorder %s656_s19, %s656_s19 }
  0x3b   :  { %p553_p13 = scmp.ne.s32.totalorder %s656_s19, %s552_s11  ;;  %p558_p1 = scmp.lt.s32.totalorder %s552_s11, %s552_s11 }
  0x3d   :  { %p559_p2 = por %p558_p1, %p557_p0 }
  0x3f   :  { %p560_p3 = pnand %p559_p2, %p553_p13 }
  0x41   :  { %563 = shalt.err (!%p560_p3)
}
  0x42   :  { %s598_s2 = smov 256   ;;  %s599_s12 = smov 16  }
  0x43   :  { %57 = dma.hbm_to_vmem [thread:$0]  %s729_s4, 8192, %s656_s19, [#allocation9], %s598_s2, %s598_s2, %s599_s12  }
  0x44   :  { %586 = dma.done.wait [#allocation3], 256  }
  0x45   :  { %587 = vsyncadd [#allocation3], 4294967040 }
  0x46   :  { %588 = dma.done.wait [#allocation6], 384  }
  0x47   :  { %589 = vsyncadd [#allocation6], 4294966912 }
  0x48   :  { %590 = dma.done.wait [#allocation9], 8192  }
  0x49   :  { %591 = vsyncadd [#allocation9], 4294959104  ;;  %v70_v0 = vld [vmem:[#allocation2] sm:$0xff]  ;;  %v71_v1 = vld [vmem:[#allocation2 + $0x8] sm:$0xff]  ;;  %vm83_vm0 = vcmask 60416   ;;  %v600_v54 = vmov 0  }
  0x4a   :  { %v687_v2 = vld [vmem:[#allocation5] sm:$0xff]  ;;  %v76_v3 = vmax.f32 %v70_v0, %v71_v1  ;;  %v689_v4 = vld [vmem:[#allocation5 + $0x8] sm:$0xff]  ;;  %v74_v6 = vld [vmem:[#allocation7] sm:$0xff]  ;;  %459 = vset.pattern.permute.xlu0 %v600_v54  ;;  %vm154_vm1 = vcmask 1043456   ;;  %vm177_vm2 = vcmask 1047556   ;;  %vm192_vm3 = vcmask 1040384  }
  0x4b   :  { %v79_v5 = vmax.f32 %v687_v2, %v689_v4  ;;  %v75_v46 = vld [vmem:[%s728_s3] sm:$0xf]  ;;  %v196_v55 = vld [vmem:[#allocation8 + $0x8] sm:$0xff]  ;;  %v195_v57 = vld [vmem:[#allocation8] sm:$0xff]  ;;  %s601_s3 = smov [#allocation10]  }
  0x4c   :  { %77 = vmax.xlane.f32.xlu0 %v76_v3  ;;  %v198_v56 = vld [vmem:[#allocation8 + $0x18] sm:$0xff]  ;;  %v197_v59 = vld [vmem:[#allocation8 + $0x10] sm:$0xff]  ;;  %v200_v60 = vld [vmem:[#allocation8 + $0x28] sm:$0xff]  ;;  %s372_s15 = sshll.u32 %s601_s3, 4  ;;  %s373_s15 = int_to_ptr.vmem [resolvable:$true] %s372_s15 }
  0x4d   :  { %v387_v58 = vpack.c.bf16 %v198_v56, %v196_v55  ;;  %v202_v61 = vld [vmem:[#allocation8 + $0x38] sm:$0xff]  ;;  %v389_v62 = vpack.c.bf16 %v197_v59, %v195_v57  ;;  %v199_v0 = vld [vmem:[#allocation8 + $0x20] sm:$0xff]  ;;  %v201_v1 = vld [vmem:[#allocation8 + $0x30] sm:$0xff]  ;;  %s564_s16 = scalar_lea.vmem %s373_s15, 256  ;;  %p569_p5 = scmp.lt.s32.totalorder %s373_s15, %s373_s15 }
  0x4e   :  { %v391_v63 = vpack.c.bf16 %v202_v61, %v200_v60  ;;  %v204_v3 = vld [vmem:[#allocation8 + $0x48] sm:$0xff]  ;;  %v235_v56 = vld [vmem:[#allocation8 + $0x140] sm:$0xff]  ;;  %v237_v57 = vld [vmem:[#allocation8 + $0x150] sm:$0xff]  ;;  %p565_p4 = scmp.ne.s32.totalorder %s373_s15, %s564_s16  ;;  %p570_p6 = scmp.lt.s32.totalorder %s564_s16, %s564_s16 }
  0x4f   :  { %388 = vmatprep.subr.bf16.mxu0 %v387_v58  ;;  %v240_v58 = vld [vmem:[#allocation8 + $0x168] sm:$0xff]  ;;  %v242_v59 = vld [vmem:[#allocation8 + $0x178] sm:$0xff]  ;;  %v429_v60 = vpack.c.bf16 %v237_v57, %v235_v56 }
  0x50   :  { %80 = vmax.xlane.f32.xlu0 %v79_v5  ;;  %v206_v5 = vld [vmem:[#allocation8 + $0x58] sm:$0xff]  ;;  %390 = vmatpush1.bf16.msra.mxu0 %v389_v62  ;;  %v431_v61 = vpack.c.bf16 %v242_v59, %v240_v58  ;;  %v239_v62 = vld [vmem:[#allocation8 + $0x160] sm:$0xff]  ;;  %p571_p7 = por %p570_p6, %p569_p5 }
  0x51   :  { %392 = vmatprep.subr.bf16.mxu0 %v391_v63  ;;  %v241_v63 = vld [vmem:[#allocation8 + $0x170] sm:$0xff] }
  0x52   :  { %p572_p8 = pnand %p571_p7, %p565_p4 }
  0xd9   :  { %v78_v7 = vpop.xlane.xlu0 %77 }
  0xda   :  { %v82_v8 = vmul.f32 %v78_v7, %v74_v6  ;;  %v118_v9 = vrot.slane %v78_v7, 4  ;;  %v395_v7 = vpack.c.bf16 %v206_v5, %v204_v3 }
  0xdc   :  { %v84_v10 = vsel %vm83_vm0, %v82_v8, 0.0  ;;  %v120_v11 = vmul.f32 %v118_v9, %v74_v6  ;;  %v203_v8 = vld [vmem:[#allocation8 + $0x40] sm:$0xff]  ;;  %v205_v9 = vld [vmem:[#allocation8 + $0x50] sm:$0xff] }
  0xdd   :  { %v85_v12 = vrot.slane %v84_v10, 4  ;;  %v81_v13 = vpop.xlane.xlu0 %80 }
  0xde   :  { %v121_v14 = vsel %vm83_vm0, %v120_v11, 0.0  ;;  %v92_v15 = vrot.slane %v81_v13, 4  ;;  %v128_v16 = vmul.f32 %v81_v13, %v74_v6  ;;  %v210_v11 = vld [vmem:[#allocation8 + $0x78] sm:$0xff] }
  0xdf   :  { %v86_v17 = vadd.f32 %v85_v12, %v84_v10  ;;  %v122_v18 = vrot.slane %v121_v14, 4  ;;  %v208_v10 = vld [vmem:[#allocation8 + $0x68] sm:$0xff]  ;;  %v397_v12 = vpack.c.bf16 %v205_v9, %v203_v8 }
  0xe0   :  { %v94_v19 = vmul.f32 %v92_v15, %v74_v6  ;;  %v130_v20 = vrot.slane %v128_v16, 4  ;;  %v393_v6 = vpack.c.bf16 %v201_v1, %v199_v0  ;;  %v399_v13 = vpack.c.bf16 %v210_v11, %v208_v10  ;;  %v209_v15 = vld [vmem:[#allocation8 + $0x70] sm:$0xff]  ;;  %v212_v16 = vld [vmem:[#allocation8 + $0x88] sm:$0xff] }
  0xe1   :  { %v123_v21 = vadd.f32 %v122_v18, %v121_v14  ;;  %v87_v24 = vrot.slane %v86_v17, 2  ;;  %v207_v14 = vld [vmem:[#allocation8 + $0x60] sm:$0xff]  ;;  %v433_v0 = vpack.c.bf16 %v241_v63, %v239_v62 }
  0xe2   :  { %v96_v22 = vrot.slane %v94_v19, 4  ;;  %v132_v23 = vsel %vm83_vm0, %v130_v20, 0.0  ;;  %394 = vmatpush1.bf16.msra.mxu0 %v393_v6  ;;  %v401_v18 = vpack.c.bf16 %v209_v15, %v207_v14  ;;  %v211_v20 = vld [vmem:[#allocation8 + $0x80] sm:$0xff]  ;;  %v244_v14 = vld [vmem:[#allocation8 + $0x188] sm:$0xff]  ;;  %v246_v15 = vld [vmem:[#allocation8 + $0x198] sm:$0xff] }
  0xe3   :  { %v124_v25 = vrot.slane %v123_v21, 2  ;;  %v133_v26 = vrot.slane %v132_v23, 4  ;;  %v88_v31 = vadd.f32 %v87_v24, %v86_v17  ;;  %396 = vmatprep.subr.bf16.mxu0 %v395_v7  ;;  %v214_v17 = vld [vmem:[#allocation8 + $0x98] sm:$0xff] }
  0xe4   :  { %v98_v27 = vsel %vm83_vm0, %v96_v22, 0.0  ;;  %v403_v19 = vpack.c.bf16 %v214_v17, %v212_v16  ;;  %v216_v22 = vld [vmem:[#allocation8 + $0xa8] sm:$0xff]  ;;  %v435_v17 = vpack.c.bf16 %v246_v15, %v244_v14 }
  0xe5   :  { %v99_v28 = vrot.slane %v98_v27, 4  ;;  %v134_v29 = vadd.f32 %v133_v26, %v132_v23  ;;  %v125_v30 = vadd.f32 %v124_v25, %v123_v21  ;;  %v89_v37 = vrot.slane %v88_v31, 1  ;;  %v213_v21 = vld [vmem:[#allocation8 + $0x90] sm:$0xff]  ;;  %v218_v23 = vld [vmem:[#allocation8 + $0xb8] sm:$0xff]  ;;  %v215_v26 = vld [vmem:[#allocation8 + $0xa0] sm:$0xff] }
  0xe6   :  { %398 = vmatpush1.bf16.msra.mxu0 %v397_v12  ;;  %v405_v24 = vpack.c.bf16 %v213_v21, %v211_v20  ;;  %v407_v25 = vpack.c.bf16 %v218_v23, %v216_v22  ;;  %v248_v21 = vld [vmem:[#allocation8 + $0x1a8] sm:$0xff]  ;;  %v250_v22 = vld [vmem:[#allocation8 + $0x1b8] sm:$0xff] }
  0xe7   :  { %v100_v32 = vadd.f32 %v99_v28, %v98_v27  ;;  %v135_v33 = vrot.slane %v134_v29, 2  ;;  %v126_v36 = vrot.slane %v125_v30, 1  ;;  %v90_v44 = vadd.f32 %v89_v37, %v88_v31  ;;  %400 = vmatprep.subr.bf16.mxu0 %v399_v13  ;;  %v217_v27 = vld [vmem:[#allocation8 + $0xb0] sm:$0xff]  ;;  %v220_v28 = vld [vmem:[#allocation8 + $0xc8] sm:$0xff] }
  0xe8   :  { %v439_v23 = vpack.c.bf16 %v250_v22, %v248_v21 }
  0xe9   :  { %v101_v34 = vrot.slane %v100_v32, 2  ;;  %v136_v35 = vadd.f32 %v135_v33, %v134_v29  ;;  %v127_v40 = vadd.f32 %v126_v36, %v125_v30  ;;  %v222_v29 = vld [vmem:[#allocation8 + $0xd8] sm:$0xff]  ;;  %v409_v30 = vpack.c.bf16 %v217_v27, %v215_v26  ;;  %v221_v33 = vld [vmem:[#allocation8 + $0xd0] sm:$0xff]  ;;  %v252_v27 = vld [vmem:[#allocation8 + $0x1c8] sm:$0xff] }
  0xea   :  { %402 = vmatpush1.bf16.msra.mxu0 %v401_v18  ;;  %v411_v31 = vpack.c.bf16 %v222_v29, %v220_v28  ;;  %v243_v18 = vld [vmem:[#allocation8 + $0x180] sm:$0xff]  ;;  %v254_v28 = vld [vmem:[#allocation8 + $0x1d8] sm:$0xff] }
  0xeb   :  { %v137_v38 = vrot.slane %v136_v35, 1  ;;  %v102_v39 = vadd.f32 %v101_v34, %v100_v32  ;;  %404 = vmatprep.subr.bf16.mxu0 %v403_v19  ;;  %v219_v32 = vld [vmem:[#allocation8 + $0xc0] sm:$0xff]  ;;  %v224_v34 = vld [vmem:[#allocation8 + $0xe8] sm:$0xff]  ;;  %v245_v19 = vld [vmem:[#allocation8 + $0x190] sm:$0xff]  ;;  %v443_v29 = vpack.c.bf16 %v254_v28, %v252_v27 }
  0xec   :  { %v413_v36 = vpack.c.bf16 %v221_v33, %v219_v32  ;;  %v437_v20 = vpack.c.bf16 %v245_v19, %v243_v18  ;;  %v256_v33 = vld [vmem:[#allocation8 + $0x1e8] sm:$0xff]  ;;  %v342_v18 = vlaneseq }
  0xed   :  { %v138_v41 = vadd.f32 %v137_v38, %v136_v35  ;;  %v103_v42 = vrot.slane %v102_v39, 1  ;;  %v226_v35 = vld [vmem:[#allocation8 + $0xf8] sm:$0xff]  ;;  %v223_v38 = vld [vmem:[#allocation8 + $0xe0] sm:$0xff] }
  0xee   :  { %406 = vmatpush1.bf16.msra.mxu0 %v405_v24  ;;  %v415_v37 = vpack.c.bf16 %v226_v35, %v224_v34  ;;  %v247_v24 = vld [vmem:[#allocation8 + $0x1a0] sm:$0xff]  ;;  %v258_v34 = vld [vmem:[#allocation8 + $0x1f8] sm:$0xff]  ;;  %v343_v19 = vshrl.u32 %v342_v18, 7 }
  0xef   :  { %v139_v43 = vadd.f32 %v138_v41, %v127_v40  ;;  %v104_v45 = vadd.f32 %v103_v42, %v102_v39  ;;  %408 = vmatprep.subr.bf16.mxu0 %v407_v25  ;;  %v225_v39 = vld [vmem:[#allocation8 + $0xf0] sm:$0xff]  ;;  %v228_v40 = vld [vmem:[#allocation8 + $0x108] sm:$0xff]  ;;  %v230_v41 = vld [vmem:[#allocation8 + $0x118] sm:$0xff]  ;;  %v447_v35 = vpack.c.bf16 %v258_v34, %v256_v33 }
  0xf0   :  { %v417_v42 = vpack.c.bf16 %v225_v39, %v223_v38  ;;  %v249_v25 = vld [vmem:[#allocation8 + $0x1b0] sm:$0xff]  ;;  %v354_v21 = vsub.s32 1, %v343_v19 }
  0xf1   :  { %v140_v47 = vmax.f32 %v139_v43, 0.0  ;;  %v105_v48 = vadd.f32 %v104_v45, %v90_v44  ;;  %v419_v43 = vpack.c.bf16 %v230_v41, %v228_v40  ;;  %v227_v44 = vld [vmem:[#allocation8 + $0x100] sm:$0xff]  ;;  %v229_v45 = vld [vmem:[#allocation8 + $0x110] sm:$0xff]  ;;  %v441_v26 = vpack.c.bf16 %v249_v25, %v247_v24 }
  0xf2   :  { %410 = vmatpush1.bf16.msra.mxu0 %v409_v30  ;;  %v251_v30 = vld [vmem:[#allocation8 + $0x1c0] sm:$0xff] }
  0xf3   :  { %v141_v49 = vmul.f32 %v140_v47, %v75_v46  ;;  %v106_v50 = vmax.f32 %v105_v48, 0.0  ;;  %412 = vmatprep.subr.bf16.mxu0 %v411_v31  ;;  %v234_v47 = vld [vmem:[#allocation8 + $0x138] sm:$0xff]  ;;  %v421_v48 = vpack.c.bf16 %v229_v45, %v227_v44  ;;  %v253_v31 = vld [vmem:[#allocation8 + $0x1d0] sm:$0xff] }
  0xf4   :  { %v445_v32 = vpack.c.bf16 %v253_v31, %v251_v30 }
  0xf5   :  { %v142_v51 = vsel %vm83_vm0, %v141_v49, 0.0  ;;  %v107_v52 = vmul.f32 %v106_v50, %v75_v46  ;;  %v232_v46 = vld [vmem:[#allocation8 + $0x128] sm:$0xff]  ;;  %v231_v50 = vld [vmem:[#allocation8 + $0x120] sm:$0xff] }
  0xf6   :  { %143 = vadd.xlane.f32.xlu1 %v142_v51  ;;  %414 = vmatpush1.bf16.msra.mxu0 %v413_v36  ;;  %v423_v49 = vpack.c.bf16 %v234_v47, %v232_v46  ;;  %v233_v51 = vld [vmem:[#allocation8 + $0x130] sm:$0xff]  ;;  %v255_v36 = vld [vmem:[#allocation8 + $0x1e0] sm:$0xff] }
  0xf7   :  { %v108_v53 = vsel %vm83_vm0, %v107_v52, 0.0  ;;  %416 = vmatprep.subr.bf16.mxu0 %v415_v37  ;;  %v236_v52 = vld [vmem:[#allocation8 + $0x148] sm:$0xff]  ;;  %v425_v54 = vpack.c.bf16 %v233_v51, %v231_v50  ;;  %v257_v37 = vld [vmem:[#allocation8 + $0x1f0] sm:$0xff] }
  0xf8   :  { %v449_v38 = vpack.c.bf16 %v257_v37, %v255_v36 }
  0xfa   :  { %109 = vadd.xlane.f32.xlu1 %v108_v53  ;;  %418 = vmatpush1.bf16.msra.mxu0 %v417_v42  ;;  %v238_v53 = vld [vmem:[#allocation8 + $0x158] sm:$0xff] }
  0xfb   :  { %420 = vmatprep.subr.bf16.mxu0 %v419_v43  ;;  %v427_v55 = vpack.c.bf16 %v238_v53, %v236_v52 }
  0xfe   :  { %422 = vmatpush1.bf16.msra.mxu0 %v421_v48 }
  0xff   :  { %424 = vmatprep.subr.bf16.mxu0 %v423_v49 }
 0x102   :  { %426 = vmatpush1.bf16.msra.mxu0 %v425_v54 }
 0x103   :  { %428 = vmatprep.subr.bf16.mxu0 %v427_v55 }
 0x106   :  { %430 = vmatpush1.bf16.msra.mxu0 %v429_v60 }
 0x107   :  { %432 = vmatprep.subr.bf16.mxu0 %v431_v61 }
 0x10a   :  { %434 = vmatpush1.bf16.msra.mxu0 %v433_v0 }
 0x10b   :  { %436 = vmatprep.subr.bf16.mxu0 %v435_v17 }
 0x10e   :  { %438 = vmatpush1.bf16.msra.mxu0 %v437_v20  ;;  %v344_v20 = vsub.s32 0, %v343_v19 }
 0x10f   :  { %440 = vmatprep.subr.bf16.mxu0 %v439_v23 }
 0x112   :  { %442 = vmatpush1.bf16.msra.mxu0 %v441_v26 }
 0x113   :  { %444 = vmatprep.subr.bf16.mxu0 %v443_v29 }
 0x116   :  { %446 = vmatpush1.bf16.msra.mxu0 %v445_v32 }
 0x117   :  { %448 = vmatprep.subr.bf16.mxu0 %v447_v35 }
 0x11a   :  { %450 = vmatpush1.bf16.msra.mxu0 %v449_v38 }
 0x183   :  { %v144_v1 = vpop.xlane.xlu1 %143 }
 0x184   :  { %v384_v3 = vmul.f32 -1.442695, %v144_v1 }
 0x186   :  { %460 = vpow2.f32 %v384_v3 }
 0x187   :  { %v110_v5 = vpop.xlane.xlu1 %109 }
 0x188   :  { %v383_v6 = vmul.f32 -1.442695, %v110_v5 }
 0x18a   :  { %462 = vpow2.f32 %v383_v6 }
 0x190   :  { %v461_v7 = vpop.eup %460 }
 0x191   :  { %v148_v8 = vadd.f32 1.0, %v461_v7 }
 0x193   :  { %464 = vrcp.f32 %v148_v8 }
 0x194   :  { %v463_v9 = vpop.eup %462 }
 0x195   :  { %v114_v10 = vadd.f32 1.0, %v463_v9 }
 0x197   :  { %466 = vrcp.f32 %v114_v10 }
 0x19d   :  { %v465_v11 = vpop.eup %464 }
 0x19e   :  { %v152_v12 = vrot.slane %v465_v11, 4 }
 0x1a1   :  { %v467_v13 = vpop.eup %466 }
 0x1a2   :  { %v155_v16 = vsel %vm154_vm1, %v467_v13, %v152_v12 }
 0x1a3   :  { %158 = vperm.xlu0 %459, %v155_v16  }
 0x222   :  { %v159_v39 = vpop.permute.xlu0 %158 }
 0x223   :  { %v161_v40 = vmul.f32 %v159_v39, %v687_v2  ;;  %v162_v41 = vmul.f32 %v159_v39, %v689_v4 }
 0x225   :  { %v163_v42 = vsel %vm154_vm1, %v161_v40, -inf  ;;  %v170_v43 = vsel %vm154_vm1, %v162_v41, -inf  ;;  %v178_v44 = vsel %vm177_vm2, %v161_v40, -inf  ;;  %v185_v45 = vsel %vm177_vm2, %v162_v41, -inf }
 0x226   :  { %v164_v46 = vrot.slane %v163_v42, 4  ;;  %v171_v47 = vrot.slane %v170_v43, 4  ;;  %v179_v48 = vrot.slane %v178_v44, 4  ;;  %v186_v49 = vrot.slane %v185_v45, 4 }
 0x228   :  { %v165_v50 = vmax.f32 %v163_v42, %v164_v46  ;;  %v172_v51 = vmax.f32 %v170_v43, %v171_v47  ;;  %v180_v52 = vmax.f32 %v178_v44, %v179_v48  ;;  %v187_v53 = vmax.f32 %v185_v45, %v186_v49 }
 0x22a   :  { %v166_v54 = vrot.slane %v165_v50, 2  ;;  %v173_v55 = vrot.slane %v172_v51, 2  ;;  %v181_v56 = vrot.slane %v180_v52, 2  ;;  %v188_v57 = vrot.slane %v187_v53, 2 }
 0x22c   :  { %v167_v58 = vmax.f32 %v165_v50, %v166_v54  ;;  %v174_v59 = vmax.f32 %v172_v51, %v173_v55  ;;  %v182_v60 = vmax.f32 %v180_v52, %v181_v56  ;;  %v189_v61 = vmax.f32 %v187_v53, %v188_v57 }
 0x22e   :  { %v168_v62 = vrot.slane %v167_v58, 1  ;;  %v183_v63 = vrot.slane %v182_v60, 1  ;;  %v175_v0 = vrot.slane %v174_v59, 1  ;;  %v190_v1 = vrot.slane %v189_v61, 1 }
 0x230   :  { %v176_v3 = vmax.f32 %v174_v59, %v175_v0  ;;  %v191_v5 = vmax.f32 %v189_v61, %v190_v1  ;;  %v169_v6 = vmax.f32 %v167_v58, %v168_v62  ;;  %v184_v7 = vmax.f32 %v182_v60, %v183_v63 }
 0x232   :  { %v194_v8 = vsel %vm192_vm3, %v176_v3, %v191_v5  ;;  %v193_v9 = vsel %vm192_vm3, %v169_v6, %v184_v7 }
 0x233   :  { %323 = vmatprep.mubr.f32.mxu0 %v194_v8 }
 0x234   :  { %324 = vmatmul.mubr.f32.vlgmr.msra.gmra.mrb[0].mxu0 %v193_v9 }
 0x307   :  { %v325_v10 = vpop.f32.mrb[0].mxu0 }
 0x308   :  { %v385_v11 = vmul.f32 -1.442695, %v325_v10  ;;  %v327_v12 = vpop.f32.mrb[1].mxu0 }
 0x309   :  { %v386_v13 = vmul.f32 -1.442695, %v327_v12 }
 0x30a   :  { %468 = vpow2.f32 %v385_v11 }
 0x30b   :  { %470 = vpow2.f32 %v386_v13 }
 0x314   :  { %v469_v14 = vpop.eup %468 }
 0x315   :  { %v471_v15 = vpop.eup %470  ;;  %v336_v16 = vadd.f32 1.0, %v469_v14 }
 0x316   :  { %v337_v17 = vadd.f32 1.0, %v471_v15 }
 0x317   :  { %472 = vrcp.f32 %v336_v16 }
 0x318   :  { %474 = vrcp.f32 %v337_v17 }
 0x321   :  { %v473_v22 = vpop.eup %472 }
 0x322   :  { %v475_v23 = vpop.eup %474  ;;  %v345_v24 = vrot.slane %v473_v22, %v344_v20  ;;  %v355_v25 = vrot.slane %v473_v22, %v354_v21 }
 0x323   :  { %v349_v26 = vrot.slane %v475_v23, %v344_v20  ;;  %v359_v27 = vrot.slane %v475_v23, %v354_v21 }
 0x324   :  { %v350_v28 = vmul.f32 %v345_v24, %v687_v2  ;;  %v360_v29 = vmul.f32 %v355_v25, %v687_v2 }
 0x325   :  { %v351_v30 = vmul.f32 %v349_v26, %v689_v4  ;;  %v361_v31 = vmul.f32 %v359_v27, %v689_v4 }
 0x326   :  { %v362_v32 = vsel %vm154_vm1, %v350_v28, %v360_v29 }
 0x327   :  { %v363_v33 = vsel %vm154_vm1, %v351_v30, %v361_v31  ;;  %364 = vst [vmem:[#allocation10] sm:$0xff] %v362_v32 }
 0x328   :  { %365 = vst [vmem:[#allocation10 + $0x8] sm:$0xff] %v363_v33 }
 0x329   :  { %575 = shalt.err (!%p572_p8)
}
 0x32a   :  { %s576_s19 = scalar_lea.hbm %s730_s5, 256 }
 0x32b   :  { %p577_p9 = scmp.ne.s32.totalorder %s730_s5, %s576_s19  ;;  %p580_p10 = scmp.lt.u32.totalorder %s576_s19, %s730_s5 }
 0x32d   :  { %p582_p11 = pnand %p580_p10, %p577_p9 }
 0x32f   :  { %585 = shalt.err (!%p582_p11)
}
 0x330   :  { %375 = dma.vmem_to_hbm [thread:$0]  %s373_s15, 256, %s730_s5, [#allocation4]  }
 0x331   :  { %592 = dma.done.wait [#allocation4], 256  }
 0x332   :  { %593 = vsyncadd [#allocation4], 4294967040 }
 0x333   :  { %379 = vsyncpa [#allocation3], 1 }
 0x334   :  { %380 = vsyncpa [#allocation6], 1 }
 0x335   :  { %381 = vsyncpa [#allocation9], 1 }
 0x336   :  { %382 = vsyncpa [#allocation4], 1 }

</bundles_post_ra>
